<compile_context>
chip_gen: v7x
topology: tpu7x:2x2x1
jax: 0.10.0
libtpu: 0.0.40
codegen_flags: <defaults>
</compile_context>

<pallas_src>
import jax
import jax.numpy as jnp
from jax.experimental import pallas as pl
from jax.experimental.pallas import tpu as pltpu

INPUT_DIM = 773
HIDDEN = 128
OUT = 3
LANE = 128


def _round_up(n, m):
    return ((n + m - 1) // m) * m


def fusion_mlp_kernel(x_ref, w1_ref, b1_ref, w2_ref, b2_ref, o_ref):
    # First linear (MXU, f32 accumulate) + bias + ReLU in the f32 accumulator,
    # then second linear — all resident in VMEM; weights stay pinned across grid steps.
    h = jnp.dot(x_ref[...], w1_ref[...], preferred_element_type=jnp.float32)
    h = jnp.maximum(h + b1_ref[...], 0.0)
    y = jnp.dot(h, w2_ref[...], preferred_element_type=jnp.float32) + b2_ref[...]
    o_ref[...] = y.astype(o_ref.dtype)


def fusion_mlp(x, w1, b1, w2, b2, *, tile_b=1024, compute_dtype=jnp.bfloat16):
    """y = relu(x @ w1 + b1) @ w2 + b2.

    x:  (B, K)        w1: (K, H)   b1: (H,)
    w2: (H, N)        b2: (N,)     returns (B, N) float32
    """
    B, D = x.shape
    K, H = w1.shape
    assert D == K
    N = w2.shape[1]

    # Pad the contraction dim to a lane multiple (773 -> 896) and the output dim to a
    # full 128-lane slab so stores are unmasked and DMAs are rectangular/aligned.
    k_pad = _round_up(K, LANE)
    n_pad = max(_round_up(N, LANE), LANE)

    # Batch tile: as big as requested, never bigger than needed, multiple of 8, and
    # keep >= 2 grid steps when the batch allows (v7x has 2 TensorCores per chip).
    tile = min(tile_b, _round_up(B, 8))
    if B > 8:
        tile = min(tile, max(8, _round_up(pl.cdiv(B, 2), 8)))
    b_pad = _round_up(B, tile)
    grid = (b_pad // tile,)

    # Zero-padding is semantics-preserving: padded K columns are zero in both x and w1,
    # padded output columns have zero weights/bias, padded batch rows are sliced away.
    xp = jnp.pad(x.astype(compute_dtype), ((0, b_pad - B), (0, k_pad - K)))
    w1p = jnp.pad(w1.astype(compute_dtype), ((0, k_pad - K), (0, 0)))
    b1_2d = b1.astype(jnp.float32).reshape(1, H)
    w2p = jnp.pad(w2.astype(jnp.float32), ((0, 0), (0, n_pad - N)))
    b2_2d = jnp.pad(b2.astype(jnp.float32), (0, n_pad - N)).reshape(1, n_pad)

    itemsize = jnp.dtype(compute_dtype).itemsize
    cost = pl.CostEstimate(
        flops=2 * b_pad * (k_pad * H + H * n_pad),
        transcendentals=0,
        bytes_accessed=(b_pad * k_pad * itemsize          # x stream (dominant)
                        + k_pad * H * itemsize            # w1 (resident)
                        + H * n_pad * 4 + H * 4 + n_pad * 4
                        + b_pad * n_pad * 4),             # output
    )

    out = pl.pallas_call(
        fusion_mlp_kernel,
        out_shape=jax.ShapeDtypeStruct((b_pad, n_pad), jnp.float32),
        grid_spec=pltpu.PrefetchScalarGridSpec(
            num_scalar_prefetch=0,
            grid=grid,
            in_specs=[
                pl.BlockSpec((tile, k_pad), lambda i: (i, 0)),   # x tile (streamed)
                pl.BlockSpec((k_pad, H), lambda i: (0, 0)),      # w1 (full, resident)
                pl.BlockSpec((1, H), lambda i: (0, 0)),          # b1
                pl.BlockSpec((H, n_pad), lambda i: (0, 0)),      # w2 (lane-padded)
                pl.BlockSpec((1, n_pad), lambda i: (0, 0)),      # b2
            ],
            out_specs=pl.BlockSpec((tile, n_pad), lambda i: (i, 0)),
        ),
        compiler_params=pltpu.CompilerParams(
            dimension_semantics=("parallel",),
            vmem_limit_bytes=64 * 1024 * 1024,
        ),
        cost_estimate=cost,
    )(xp, w1p, b1_2d, w2p, b2_2d)

    return out[:B, :N]


def reference_mlp(x, w1, b1, w2, b2):
    h = jnp.maximum(x @ w1 + b1, 0.0)
    return h @ w2 + b2


if __name__ == "__main__":
    key = jax.random.PRNGKey(0)
    kx, kw1, kb1, kw2, kb2 = jax.random.split(key, 5)

    B = 16  # small batch; tile logic picks tile=8 -> 2 grid steps
    x = jax.random.normal(kx, (B, INPUT_DIM), dtype=jnp.float32)

    # Deterministic init mimicking nn.Linear's U(-1/sqrt(fan_in), 1/sqrt(fan_in)).
    bound1 = 1.0 / jnp.sqrt(jnp.float32(INPUT_DIM))
    w1 = jax.random.uniform(kw1, (INPUT_DIM, HIDDEN), jnp.float32, -bound1, bound1)
    b1 = jax.random.uniform(kb1, (HIDDEN,), jnp.float32, -bound1, bound1)
    bound2 = 1.0 / jnp.sqrt(jnp.float32(HIDDEN))
    w2 = jax.random.uniform(kw2, (HIDDEN, OUT), jnp.float32, -bound2, bound2)
    b2 = jax.random.uniform(kb2, (OUT,), jnp.float32, -bound2, bound2)

    # Default path: bf16 x/w1 compute (f32 accumulate) -> relaxed tolerance vs f32 ref.
    out = fusion_mlp(x, w1, b1, w2, b2)
    out = jax.block_until_ready(out)

    ref = reference_mlp(x, w1, b1, w2, b2)
    assert out.shape == (B, OUT)
    assert jnp.allclose(out, ref, atol=3e-2, rtol=3e-2), "mismatch vs JAX reference"

    print("KERNEL_OK")
</pallas_src>

<mosaic_0001>
module attributes {stable_mosaic.version = 11 : i64} {
  func.func @fusion_mlp_kernel(%arg0: i32, %arg1: memref<8x896xbf16, #tpu.memory_space<vmem>>, %arg2: memref<896x128xbf16, #tpu.memory_space<vmem>>, %arg3: memref<1x128xf32, #tpu.memory_space<vmem>>, %arg4: memref<128x128xf32, #tpu.memory_space<vmem>>, %arg5: memref<1x128xf32, #tpu.memory_space<vmem>>, %arg6: memref<8x128xf32, #tpu.memory_space<vmem>>) attributes {dimension_semantics = [#tpu.dimension_semantics<parallel>], iteration_bounds = array<i64: 2>, scalar_prefetch = 0 : i64, scratch_operands = 0 : i64, tpu.core_type = #tpu.core_type<tc>, window_params = [{transform_indices = @transform_0, window_bounds = array<i64: 8, 896>}, {pipeline_mode = #tpu.pipeline_mode<synchronous>, transform_indices = @transform_1, window_bounds = array<i64: 896, 128>}, {pipeline_mode = #tpu.pipeline_mode<synchronous>, transform_indices = @transform_2, window_bounds = array<i64: 1, 128>}, {pipeline_mode = #tpu.pipeline_mode<synchronous>, transform_indices = @transform_3, window_bounds = array<i64: 128, 128>}, {pipeline_mode = #tpu.pipeline_mode<synchronous>, transform_indices = @transform_4, window_bounds = array<i64: 1, 128>}, {transform_indices = @transform_5, window_bounds = array<i64: 8, 128>}]} {
    %c0 = arith.constant 0 : index
    %c0_0 = arith.constant 0 : index
    %0 = vector.load %arg1[%c0, %c0_0] : memref<8x896xbf16, #tpu.memory_space<vmem>>, vector<8x896xbf16>
    %c0_1 = arith.constant 0 : index
    %c0_2 = arith.constant 0 : index
    %1 = vector.load %arg2[%c0_1, %c0_2] : memref<896x128xbf16, #tpu.memory_space<vmem>>, vector<896x128xbf16>
    %cst = arith.constant dense<0.000000e+00> : vector<8x128xf32>
    %2 = tpu.matmul %0, %1, %cst {dimension_numbers = #tpu.dot_dimension_numbers<[1], [0], [0], [1], [0, 0, 1, 1], [], []>} : vector<8x896xbf16>, vector<896x128xbf16>, vector<8x128xf32> -> vector<8x128xf32>
    %c0_3 = arith.constant 0 : index
    %c0_4 = arith.constant 0 : index
    %3 = vector.load %arg3[%c0_3, %c0_4] : memref<1x128xf32, #tpu.memory_space<vmem>>, vector<1x128xf32>
    %4 = vector.broadcast %3 : vector<1x128xf32> to vector<8x128xf32>
    %5 = arith.addf %2, %4 : vector<8x128xf32>
    %cst_5 = arith.constant 0.000000e+00 : f32
    %6 = vector.broadcast %cst_5 : f32 to vector<8x128xf32>
    %7 = arith.maximumf %5, %6 : vector<8x128xf32>
    %c0_6 = arith.constant 0 : index
    %c0_7 = arith.constant 0 : index
    %8 = vector.load %arg4[%c0_6, %c0_7] : memref<128x128xf32, #tpu.memory_space<vmem>>, vector<128x128xf32>
    %cst_8 = arith.constant dense<0.000000e+00> : vector<8x128xf32>
    %9 = tpu.matmul %7, %8, %cst_8 {dimension_numbers = #tpu.dot_dimension_numbers<[1], [0], [0], [1], [0, 0, 1, 1], [], []>} : vector<8x128xf32>, vector<128x128xf32>, vector<8x128xf32> -> vector<8x128xf32>
    %c0_9 = arith.constant 0 : index
    %c0_10 = arith.constant 0 : index
    %10 = vector.load %arg5[%c0_9, %c0_10] : memref<1x128xf32, #tpu.memory_space<vmem>>, vector<1x128xf32>
    %11 = vector.broadcast %10 : vector<1x128xf32> to vector<8x128xf32>
    %12 = arith.addf %9, %11 : vector<8x128xf32>
    %c0_11 = arith.constant 0 : index
    %c0_12 = arith.constant 0 : index
    %13 = vector.load %arg6[%c0_11, %c0_12] : memref<8x128xf32, #tpu.memory_space<vmem>>, vector<8x128xf32>
    tpu.vector_store %arg6[%c0_11, %c0_12], %12 {strides = array<i32>} : memref<8x128xf32, #tpu.memory_space<vmem>>, vector<8x128xf32>,
    return
  }
  func.func @transform_0(%arg0: i32) -> (i32, i32) {
    %c0_i32 = arith.constant 0 : i32
    %c0_i32_0 = arith.constant 0 : i32
    return %arg0, %c0_i32 : i32, i32
  }
  func.func @transform_1(%arg0: i32) -> (i32, i32) {
    %c0_i32 = arith.constant 0 : i32
    %c0_i32_0 = arith.constant 0 : i32
    %c0_i32_1 = arith.constant 0 : i32
    return %c0_i32, %c0_i32_0 : i32, i32
  }
  func.func @transform_2(%arg0: i32) -> (i32, i32) {
    %c0_i32 = arith.constant 0 : i32
    %c0_i32_0 = arith.constant 0 : i32
    %c0_i32_1 = arith.constant 0 : i32
    return %c0_i32, %c0_i32_0 : i32, i32
  }
  func.func @transform_3(%arg0: i32) -> (i32, i32) {
    %c0_i32 = arith.constant 0 : i32
    %c0_i32_0 = arith.constant 0 : i32
    %c0_i32_1 = arith.constant 0 : i32
    return %c0_i32, %c0_i32_0 : i32, i32
  }
  func.func @transform_4(%arg0: i32) -> (i32, i32) {
    %c0_i32 = arith.constant 0 : i32
    %c0_i32_0 = arith.constant 0 : i32
    %c0_i32_1 = arith.constant 0 : i32
    return %c0_i32, %c0_i32_0 : i32, i32
  }
  func.func @transform_5(%arg0: i32) -> (i32, i32) {
    %c0_i32 = arith.constant 0 : i32
    %c0_i32_0 = arith.constant 0 : i32
    return %arg0, %c0_i32 : i32, i32
  }
}

</mosaic_0001>

<bundles_post_ra>
// kernel: tpu_custom_call.1
= control target key start
LH: loop header
LB: loop body
LE: loop exit
PB: predicated region body
PF: predicated region fallthrough
CT: control target
= control target key end

     0   :  { %10 = vsyncpa [#allocation3], 0  ;;  %s2111_s0 = inlined_call_operand.hbm [shape: bf16[16,896], index: 0, kind: input, shape index: {}]   ;;  %s2112_s1 = inlined_call_operand.hbm [shape: bf16[896,128], index: 1, kind: input, shape index: {}]   ;;  %s2113_s2 = inlined_call_operand.hbm [shape: f32[1,128], index: 2, kind: input, shape index: {}]   ;;  %s2114_s3 = inlined_call_operand.hbm [shape: f32[128,128], index: 3, kind: input, shape index: {}]   ;;  %s2115_s4 = inlined_call_operand.hbm [shape: f32[1,128], index: 4, kind: input, shape index: {}]   ;;  %s2116_s5 = inlined_call_operand.hbm [shape: f32[16,128], index: 5, kind: output, shape index: {}]  }
   0x1   :  { %12 = vsyncpa [#allocation3 + $0x1], 0 }
   0x2   :  { %13 = vsyncpa [#allocation6], 0 }
   0x3   :  { %14 = vsyncpa [#allocation9], 0 }
   0x4   :  { %15 = vsyncpa [#allocation4], 0 }
   0x5   :  { %17 = vsyncpa [#allocation4 + $0x1], 0  ;;  %s1832_s18 = smov 0   ;;  %s1834_s19 = smov 0  }
   0x6   :  { %s1836_s20 = smov 0   ;;  %s1838_s21 = smov 0  }
   0x7 LB: > { %s1789_s22 = smov [#allocation5]   ;;  %s1853_s24 = sadd.s32 4294967295, %s1787_s21   ;;  %s1787_s21 = sphi %s1838_s21, %s2139_s21   ;;  %s1783_s20 = sphi %s1836_s20, %s2138_s20   ;;  %s1779_s19 = sphi %s1834_s19, %s2137_s19   ;;  %s1775_s18 = sphi %s1832_s18, %s2136_s18  }
   0x8   : > { %s176_s23 = sshll.u32 %s1789_s22, 4  ;;  %p1158_p0 = scmp.ge.s32.totalorder %s1787_s21, 1  ;;  %s1858_s23 = int_to_ptr.vmem [resolvable:$true] %s176_s23 }
   0x9   : > { %p2117_p1 = scmp.eq.s32.totalorder %s1853_s24, 0  ;;  %p164_p2 = scmp.lt.s32.totalorder %s1787_s21, 3 }
   0xa   : > { %s1790_s26 = smov [#allocation8]   ;;  %s1791_s29 = smov [#allocation7]  }
   0xb   : > { %p1860_p3 = pnand %p1158_p0, %p164_p2  ;;  %s200_s27 = sshll.u32 %s1790_s26, 4  ;;  %s1873_s27 = int_to_ptr.vmem [resolvable:$true] %s200_s27 }
   0xc   : > { %s1875_s30 = sshll.u32 %s1791_s29, 4  ;;  %s1571_s8 = scalar_lea.hbm %s2112_s1, 7168  ;;  %s191_s30 = int_to_ptr.vmem [resolvable:$true] %s1875_s30 }
   0xd   : > { %s2120_s25 = scalar_select %p1860_p3, 1, 0 }
   0xe   : > { %p1434_p5 = pneg %p1860_p3  ;;  %p1572_p7 = scmp.ne.s32.totalorder %s2112_s1, %s1571_s8 }
   0xf   : > { %p1578_p11 = scmp.lt.u32.totalorder %s1571_s8, %s2112_s1 }
  0x10   : > { %p1869_p6 = pnand %p1434_p5, %p2117_p1 }
  0x12   : > { %p1885_p8 = pneg %p1869_p6 }
  0x14   : > { %p1574_p9 = pnand %p1885_p8, %p1572_p7 }
  0x16   : > { %p1575_p10 = pneg %p1574_p9 }
  0x18   : > { %p1580_p12 = pnand %p1578_p11, %p1575_p10 }
  0x1a   : > { %1583 = shalt.err (!%p1580_p12)
}
  0x1b   : > { %s1584_s14 = scalar_lea.vmem %s1858_s23, 7168  ;;  %p1592_p5 = scmp.lt.s32.totalorder %s1858_s23, %s1858_s23 }
  0x1c   : > { %p1585_p13 = scmp.ne.s32.totalorder %s1858_s23, %s1584_s14  ;;  %p1593_p4 = scmp.lt.s32.totalorder %s1584_s14, %s1584_s14 }
  0x1e   : > { %p1587_p0 = pnand %p1585_p13, %p1885_p8  ;;  %p1594_p7 = por %p1593_p4, %p1592_p5 }
  0x20   : > { %p1588_p2 = pneg %p1587_p0 }
  0x22   : > { %p1595_p9 = pnand %p1594_p7, %p1588_p2 }
  0x24   : > { %1598 = shalt.err (!%p1595_p9)
}
  0x25   : > { %s1792_s15 = smov 64   ;;  %s1793_s16 = smov 4  }
  0x26   : > { %1437 = dma.hbm_to_vmem [thread:$0]  (!%p1869_p6), %s2112_s1, 7168, %s1858_s23, [#allocation6], %s1792_s15, %s1792_s15, %s1793_s16  }
  0x27   : > { %s1599_s6 = scalar_lea.hbm %s2114_s3, 2048 }
  0x28   : > { %p1600_p4 = scmp.ne.s32.totalorder %s2114_s3, %s1599_s6  ;;  %p1606_p12 = scmp.lt.u32.totalorder %s1599_s6, %s2114_s3 }
  0x2a   : > { %p1602_p10 = pnand %p1600_p4, %p1885_p8 }
  0x2c   : > { %p1603_p11 = pneg %p1602_p10 }
  0x2e   : > { %p1608_p13 = pnand %p1606_p12, %p1603_p11 }
  0x30   : > { %1611 = shalt.err (!%p1608_p13)
}
  0x31   : > { %s1612_s23 = scalar_lea.vmem %s1873_s27, 2048  ;;  %p1620_p7 = scmp.lt.s32.totalorder %s1873_s27, %s1873_s27 }
  0x32   : > { %p1613_p0 = scmp.ne.s32.totalorder %s1873_s27, %s1612_s23  ;;  %p1621_p9 = scmp.lt.s32.totalorder %s1612_s23, %s1612_s23 }
  0x34   : > { %p1615_p2 = pnand %p1613_p0, %p1885_p8  ;;  %p1622_p4 = por %p1621_p9, %p1620_p7 }
  0x36   : > { %p1616_p5 = pneg %p1615_p2 }
  0x38   : > { %p1623_p10 = pnand %p1622_p4, %p1616_p5 }
  0x3a   : > { %1626 = shalt.err (!%p1623_p10)
}
  0x3b   : > { %s1794_s12 = smov 128   ;;  %s1795_s13 = smov 8  }
  0x3c   : > { %1443 = dma.hbm_to_vmem [thread:$0]  (!%p1869_p6), %s2114_s3, 2048, %s1873_s27, [#allocation9], %s1794_s12, %s1794_s12, %s1795_s13  }
  0x3d   : > { %s1627_s22 = scalar_lea.hbm %s2113_s2, 16 }
  0x3e   : > { %p1628_p11 = scmp.ne.s32.totalorder %s2113_s2, %s1627_s22  ;;  %p1634_p0 = scmp.lt.u32.totalorder %s1627_s22, %s2113_s2 }
  0x40   : > { %p1630_p12 = pnand %p1628_p11, %p1885_p8 }
  0x42   : > { %p1631_p13 = pneg %p1630_p12 }
  0x44   : > { %p1636_p2 = pnand %p1634_p0, %p1631_p13 }
  0x46   : > { %1639 = shalt.err (!%p1636_p2)
}
  0x47   : > { %s1640_s8 = scalar_lea.vmem %s191_s30, 16  ;;  %s1647_s27 = scalar_lea.vmem %s191_s30, 32 }
  0x48   : > { %p1641_p5 = scmp.ne.s32.totalorder %s191_s30, %s1640_s8  ;;  %p1648_p4 = scmp.lt.s32.totalorder %s191_s30, %s191_s30 }
  0x49   : > { %p1649_p10 = scmp.lt.s32.totalorder %s1647_s27, %s1640_s8 }
  0x4a   : > { %p1643_p7 = pnand %p1641_p5, %p1885_p8 }
  0x4b   : > { %p1650_p1 = por %p1649_p10, %p1648_p4 }
  0x4c   : > { %p1644_p9 = pneg %p1643_p7 }
  0x4e   : > { %p1651_p3 = pnand %p1650_p1, %p1644_p9 }
  0x50   : > { %1654 = shalt.err (!%p1651_p3)
}
  0x51   : > { %1440 = dma.hbm_to_vmem [thread:$0]  (!%p1869_p6), %s2113_s2, 16, %s191_s30, [#allocation6]  }
  0x52   : > { %s1796_s23 = smov [#allocation10]   ;;  %s1655_s15 = scalar_lea.hbm %s2115_s4, 16 }
  0x53   : > { %s214_s12 = sshll.u32 %s1796_s23, 4  ;;  %p1656_p11 = scmp.ne.s32.totalorder %s2115_s4, %s1655_s15  ;;  %s215_s12 = int_to_ptr.vmem [resolvable:$true] %s214_s12 }
  0x54   : > { %p1662_p12 = scmp.lt.u32.totalorder %s1655_s15, %s2115_s4 }
  0x55   : > { %p1658_p1 = pnand %p1656_p11, %p1885_p8 }
  0x57   : > { %p1659_p3 = pneg %p1658_p1 }
  0x59   : > { %p1664_p13 = pnand %p1662_p12, %p1659_p3 }
  0x5b   : > { %1667 = shalt.err (!%p1664_p13)
}
  0x5c   : > { %s1668_s30 = scalar_lea.vmem %s215_s12, 16  ;;  %s1675_s29 = scalar_lea.vmem %s215_s12, 32 }
  0x5d   : > { %p1669_p0 = scmp.ne.s32.totalorder %s215_s12, %s1668_s30  ;;  %p1676_p7 = scmp.lt.s32.totalorder %s215_s12, %s215_s12 }
  0x5e   : > { %p1677_p9 = scmp.lt.s32.totalorder %s1675_s29, %s1668_s30 }
  0x5f   : > { %p1671_p2 = pnand %p1669_p0, %p1885_p8 }
  0x60   : > { %p1678_p4 = por %p1677_p9, %p1676_p7 }
  0x61   : > { %p1672_p5 = pneg %p1671_p2 }
  0x63   : > { %p1679_p10 = pnand %p1678_p4, %p1672_p5 }
  0x65   : > { %1682 = shalt.err (!%p1679_p10)
}
  0x66   : > { %1446 = dma.hbm_to_vmem [thread:$0]  (!%p1869_p6), %s2115_s4, 16, %s215_s12, [#allocation9]  }
  0x67   : > { %s1157_s11 = sadd.s32 4294967294, %s1787_s21   ;;  %s1968_s28 = sadd.s32 1, %s1787_s21  }
  0x68   : > { %s27_s8 = ssub.s32 %s1787_s21, %s1968_s28  ;;  %s30_s27 = sadd.s32 1, %s1783_s20 }
  0x69   : > { %p28_p8 = scmp.eq.s32.totalorder %s27_s8, 0  ;;  %p37_p11 = scmp.ne.s32.totalorder %s1783_s20, %s1779_s19 }
  0x6a   : > { %p38_p1 = scmp.eq.s32.totalorder %s1787_s21, 0  ;;  %p43_p3 = scmp.ne.s32.totalorder %s1779_s19, %s1775_s18 }
  0x6b   : > { %s1979_s9 = scalar_select %p28_p8, %s1783_s20, %s30_s27  }
  0x6c   : > { %p39_p12 = por %p38_p1, %p37_p11  ;;  %p2123_p13 = scmp.eq.s32.totalorder %s1853_s24, 0 }
  0x6d   : > { %p151_p6 = scmp.eq.s32.totalorder %s1853_s24, 1  ;;  %p157_p2 = scmp.eq.s32.totalorder %s1157_s11, 1 }
  0x6e   : > { %p1983_p0 = por %p2123_p13, %p43_p3  ;;  %p1459_p5 = scmp.lt.s32.totalorder %s1787_s21, 2 }
  0x6f   : > { %s225_s23 = sand.u32 1, %s1783_s20   ;;  %p1990_p7 = por %p151_p6, %p37_p11 }
  0x70   : > { %p1994_p9 = por %p157_p2, %p43_p3  ;;  %s1411_s14 = smul.u32 28, %s225_s23 }
  0x71   : > { %s2125_s12 = scalar_select %p1990_p7, 1, 0 }
  0x72   : > { %s2126_s13 = scalar_select %p1994_p9, 1, 0 }
  0x73   : > { %s1412_s15 = smul.u32 448, %s1787_s21  ;;  %p1999_p4 = pnand %p1459_p5, %p39_p12 }
  0x74   : > { %s229_s30 = scalar_lea.vmem [#allocation2], %s1411_s14  ;;  %s226_s6 = scalar_lea.sflag [#allocation3], %s225_s23 }
  0x75   : > { %s2006_s26 = scalar_lea.hbm %s2111_s0, %s1412_s15  ;;  %s237_s29 = sshll.u32 %s229_s30, 4  ;;  %s2008_s29 = int_to_ptr.vmem [resolvable:$true] %s237_s29 }
  0x76   : > { %s1683_s7 = scalar_lea.hbm %s2006_s26, 448  ;;  %p1685_p8 = pneg %p1999_p4 }
  0x77   : > { %p1684_p10 = scmp.ne.s32.totalorder %s2006_s26, %s1683_s7  ;;  %s1688_s27 = scalar_lea.hbm %s2111_s0, 896 }
  0x78   : > { %p1689_p3 = scmp.lt.u32.totalorder %s2006_s26, %s2111_s0  ;;  %p1690_p12 = scmp.lt.u32.totalorder %s1688_s27, %s1683_s7 }
  0x79   : > { %p1686_p11 = pnand %p1685_p8, %p1684_p10  ;;  %p1692_p6 = scmp.lt.u32.totalorder %s1683_s7, %s2006_s26 }
  0x7a   : > { %p1691_p13 = por %p1690_p12, %p1689_p3 }
  0x7b   : > { %p1687_p1 = pneg %p1686_p11 }
  0x7c   : > { %p1693_p2 = por %p1692_p6, %p1691_p13 }
  0x7e   : > { %p1694_p5 = pnand %p1693_p2, %p1687_p1 }
  0x80   : > { %1697 = shalt.err (!%p1694_p5)
}
  0x81   : > { %s1698_s23 = scalar_lea.vmem %s2008_s29, 448  ;;  %s1797_s14 = smov [#allocation2]  }
  0x82   : > { %p1699_p10 = scmp.ne.s32.totalorder %s2008_s29, %s1698_s23  ;;  %s1703_s22 = sshll.u32 %s1797_s14, 4  ;;  %s1704_s22 = int_to_ptr.vmem [resolvable:$false] %s1703_s22 }
  0x83   : > { %s1705_s30 = scalar_lea.vmem %s1704_s22, 896  ;;  %p1706_p7 = scmp.lt.s32.totalorder %s2008_s29, %s1704_s22 }
  0x84   : > { %p1701_p11 = pnand %p1699_p10, %p1685_p8  ;;  %p1707_p3 = scmp.lt.s32.totalorder %s1705_s30, %s1698_s23 }
  0x86   : > { %p1702_p9 = pneg %p1701_p11  ;;  %p1708_p12 = por %p1707_p3, %p1706_p7 }
  0x88   : > { %p1709_p13 = pnand %p1708_p12, %p1702_p9 }
  0x8a   : > { %1712 = shalt.err (!%p1709_p13)
}
  0x8b   : > { %1450 = dma.hbm_to_vmem [thread:$0]  (!%p1999_p4), %s2006_s26, 448, %s2008_s29, %s226_s6  }
  0x8c   : > { %p2128_p1 = scmp.ne.s32.totalorder %s2120_s25, 0 }
  0x8d   : > { %s2038_s7 = sand.u32 (!%p2128_p1), 1, %s1779_s19  }
  0x8e   : > { %246 = sbr.rel (%p2128_p1) target bundleno = 670 (0x29e), region = 40  ;;  %s249_s8 = scalar_lea.sflag (!%p2128_p1), [#allocation3], %s2038_s7 }
  0x8f   : > { %s1413_s11 = smul.u32 (!%p2128_p1), 28, %s2038_s7 }
  0x91   : > { %s2042_s27 = scalar_lea.vmem (!%p2128_p1), [#allocation2], %s1413_s11 }
  0x95   : > { %1758 = dma.done.wait (%p1983_p0), %s249_s8, 448  }
  0x96   : > { %1760 = vsyncadd (%p1983_p0), %s249_s8, 4294966848  ;;  %p2129_p7 = scmp.eq.s32.totalorder %s1853_s24, 0 }
  0x98   : > { %1762 = dma.done.wait (%p2129_p7), [#allocation6], 7184   ;;  %p2130_p9 = pmov %p2129_p7 }
  0x99   : > { %p2131_p4 = pmov %p2129_p7 }
  0x9a   : > { %1764 = vsyncadd (%p2130_p9), [#allocation6], 4294960112 }
  0x9b   : > { %1766 = dma.done.wait (%p2131_p4), [#allocation9], 2064   ;;  %p2132_p8 = pmov %p2131_p4 }
  0x9c   : > { %v1508_v0 = vld [vmem:[#allocation5 + $0x40] sm:$0xff]   ;;  %v1512_v4 = vld [vmem:[#allocation5 + $0x48] sm:$0xff]   ;;  %v1516_v8 = vld [vmem:[#allocation5 + $0x50] sm:$0xff]   ;;  %v1798_v42 = vmov 0.0   ;;  %vm1799_vm0 = vmmov 0   ;;  %s1170_s25 = sshll.u32 %s2038_s7, 3 }
  0x9d   : > { %1768 = vsyncadd (%p2132_p8), [#allocation9], 4294965232  ;;  %v1509_v1 = vld [vmem:[#allocation5] sm:$0xff]   ;;  %1240 = vmatprep.subr.bf16.mxu0 %v1508_v0  ;;  %v1513_v5 = vld [vmem:[#allocation5 + $0x8] sm:$0xff]   ;;  %s1237_s10 = sshll.u32 %s1853_s24, 7  ;;  %s294_s16 = scalar_lea.vmem [#allocation11], %s1170_s25 }
  0x9e   : > { %v1510_v2 = vld [vmem:[#allocation5 + $0xc0] sm:$0xff]   ;;  %1241 = vmatpush3.bf16.msra.mxu0 %v1509_v1  ;;  %v1514_v6 = vld [vmem:[#allocation5 + $0xc8] sm:$0xff]   ;;  %v1517_v9 = vld [vmem:[#allocation5 + $0x10] sm:$0xff]   ;;  %s1049_s26 = sshll.u32 %s294_s16, 4  ;;  %s2067_s15 = scalar_lea.hbm %s2116_s5, %s1237_s10  ;;  %s2069_s26 = int_to_ptr.vmem [resolvable:$true] %s1049_s26 }
  0x9f   : > { %v1511_v3 = vld [vmem:[#allocation5 + $0x80] sm:$0xff]   ;;  %1262 = vmatprep.subr.bf16.mxu1 %v1510_v2  ;;  %1242 = vmatprep.subr.bf16.mxu0 %v1512_v4  ;;  %v1515_v7 = vld [vmem:[#allocation5 + $0x88] sm:$0xff]   ;;  %v1518_v10 = vld [vmem:[#allocation5 + $0xd0] sm:$0xff]   ;;  %s1036_s17 = scalar_lea.sflag [#allocation4], %s2038_s7  ;;  %s1713_s23 = scalar_lea.vmem %s2069_s26, 128 }
  0xa0   : > { %1263 = vmatpush3.bf16.msra.mxu1 %v1511_v3  ;;  %v1519_v11 = vld [vmem:[#allocation5 + $0x90] sm:$0xff]   ;;  %v1520_v12 = vld [vmem:[#allocation5 + $0x58] sm:$0xff]   ;;  %v1524_v16 = vld [vmem:[#allocation5 + $0x60] sm:$0xff]   ;;  %p1714_p0 = scmp.ne.s32.totalorder %s2069_s26, %s1713_s23  ;;  %p2133_p6 = scmp.ne.s32.totalorder %s2125_s12, 0 }
  0xa1   : > { %1264 = vmatprep.subr.bf16.mxu1 %v1514_v6  ;;  %v1521_v13 = vld [vmem:[#allocation5 + $0x18] sm:$0xff]   ;;  %v1525_v17 = vld [vmem:[#allocation5 + $0x20] sm:$0xff]   ;;  %v1528_v20 = vld [vmem:[#allocation5 + $0x68] sm:$0xff]   ;;  %v1800_v6 = vmov 0.0|0.0   ;;  %s1801_s24 = smov [#allocation11]  }
  0xa2   : > { %1243 = vmatpush3.bf16.msra.mxu0 %v1513_v5  ;;  %v1522_v14 = vld [vmem:[#allocation5 + $0xd8] sm:$0xff]   ;;  %v1526_v18 = vld [vmem:[#allocation5 + $0xe0] sm:$0xff]   ;;  %v1529_v21 = vld [vmem:[#allocation5 + $0x28] sm:$0xff]   ;;  %p1715_p2 = pnand %p1714_p0, %p2133_p6  ;;  %s1717_s14 = sshll.u32 %s1801_s24, 4  ;;  %s1718_s14 = int_to_ptr.vmem [resolvable:$false] %s1717_s14 }
  0xa3   : > { %1244 = vmatprep.subr.bf16.mxu0 %v1516_v8  ;;  %v1523_v15 = vld [vmem:[#allocation5 + $0x98] sm:$0xff]   ;;  %v1527_v19 = vld [vmem:[#allocation5 + $0xa0] sm:$0xff]   ;;  %v1530_v22 = vld [vmem:[#allocation5 + $0xe8] sm:$0xff]   ;;  %s1719_s22 = scalar_lea.vmem %s1718_s14, 256  ;;  %p1720_p10 = scmp.lt.s32.totalorder %s2069_s26, %s1718_s14 }
  0xa4   : > { %1265 = vmatpush3.bf16.msra.mxu1 %v1515_v7  ;;  %v1531_v23 = vld [vmem:[#allocation5 + $0xa8] sm:$0xff]   ;;  %v1532_v24 = vld [vmem:[#allocation5 + $0x70] sm:$0xff]   ;;  %v1536_v28 = vld [vmem:[#allocation5 + $0x78] sm:$0xff]   ;;  %p1716_p5 = pneg %p1715_p2  ;;  %p1721_p11 = scmp.lt.s32.totalorder %s1719_s22, %s1713_s23 }
  0xa5   : > { %1266 = vmatprep.subr.bf16.mxu1 %v1518_v10  ;;  %v1533_v25 = vld [vmem:[#allocation5 + $0x30] sm:$0xff]   ;;  %v1537_v29 = vld [vmem:[#allocation5 + $0x38] sm:$0xff]   ;;  %v296_v31 = vld [vmem:[%s2042_s27] sm:$0xff] }
  0xa6   : > { %1245 = vmatpush3.bf16.msra.mxu0 %v1517_v9  ;;  %v1534_v26 = vld [vmem:[#allocation5 + $0xf0] sm:$0xff]   ;;  %v1538_v30 = vld [vmem:[#allocation5 + $0xf8] sm:$0xff]   ;;  %v1172_v32 = vcombine.low %v296_v31, %v296_v31  ;;  %v1173_v33 = vcombine.high %v296_v31, %v296_v31  ;;  %v1542_v35 = vld [vmem:[#allocation5 + $0x140] sm:$0xff]   ;;  %p1722_p3 = por %p1721_p11, %p1720_p10 }
  0xa7   : > { %1246 = vmatprep.subr.bf16.mxu0 %v1520_v12  ;;  %v1535_v27 = vld [vmem:[#allocation5 + $0xb0] sm:$0xff]   ;;  %v1541_v34 = vld [vmem:[#allocation5 + $0xb8] sm:$0xff]   ;;  %v1545_v39 = vld [vmem:[#allocation5 + $0x100] sm:$0xff]  }
  0xa8   : > { %1267 = vmatpush3.bf16.msra.mxu1 %v1519_v11  ;;  %v297_v36 = vld [vmem:[%s2042_s27 + $0x8] sm:$0xff]  ;;  %812 = vmatprep.mubr.bf16.mxu0 %v1173_v33  ;;  %v1546_v40 = vld [vmem:[#allocation5 + $0x180] sm:$0xff]   ;;  %v1553_v48 = vld [vmem:[#allocation5 + $0x158] sm:$0xff]   ;;  %p1723_p12 = pnand %p1722_p3, %p1716_p5 }
  0xa9   : > { %1268 = vmatprep.subr.bf16.mxu1 %v1522_v14  ;;  %v1174_v37 = vcombine.low %v297_v36, %v297_v36  ;;  %v1175_v38 = vcombine.high %v297_v36, %v297_v36  ;;  %v1547_v41 = vld [vmem:[#allocation5 + $0x148] sm:$0xff]   ;;  %v1550_v45 = vld [vmem:[#allocation5 + $0x150] sm:$0xff]   ;;  %v1554_v49 = vld [vmem:[#allocation5 + $0x118] sm:$0xff]  }
  0xaa   : > { %1247 = vmatpush3.bf16.msra.mxu0 %v1521_v13  ;;  %v1548_v43 = vld [vmem:[#allocation5 + $0x108] sm:$0xff]   ;;  %v1551_v46 = vld [vmem:[#allocation5 + $0x110] sm:$0xff]   ;;  %v1556_v50 = vld [vmem:[#allocation5 + $0x160] sm:$0xff]  }
  0xab   : > { %1248 = vmatprep.subr.bf16.mxu0 %v1524_v16  ;;  %852 = vmatprep.mubr.bf16.mxu1 %v1175_v38  ;;  %v1549_v44 = vld [vmem:[#allocation5 + $0x188] sm:$0xff]   ;;  %v1552_v47 = vld [vmem:[#allocation5 + $0x190] sm:$0xff]   ;;  %v1555_v51 = vld [vmem:[#allocation5 + $0x198] sm:$0xff]  }
  0xac   : > { %1269 = vmatpush3.bf16.msra.mxu1 %v1523_v15  ;;  %v1557_v52 = vld [vmem:[#allocation5 + $0x120] sm:$0xff]   ;;  %v1559_v53 = vld [vmem:[#allocation5 + $0x168] sm:$0xff]   ;;  %v1562_v56 = vld [vmem:[#allocation5 + $0x170] sm:$0xff]  }
  0xad   : > { %1270 = vmatprep.subr.bf16.mxu1 %v1526_v18  ;;  %v1558_v54 = vld [vmem:[#allocation5 + $0x1a0] sm:$0xff]   ;;  %v1560_v55 = vld [vmem:[#allocation5 + $0x128] sm:$0xff]   ;;  %v298_v58 = vld [vmem:[%s2042_s27 + $0x10] sm:$0xff] }
  0xae   : > { %1249 = vmatpush3.bf16.msra.mxu0 %v1525_v17  ;;  %v1561_v57 = vld [vmem:[#allocation5 + $0x1a8] sm:$0xff]   ;;  %v1563_v59 = vld [vmem:[#allocation5 + $0x130] sm:$0xff]   ;;  %v1177_v60 = vcombine.high %v298_v58, %v298_v58  ;;  %v1565_v61 = vld [vmem:[#allocation5 + $0x178] sm:$0xff]   ;;  %v1176_v1 = vcombine.low %v298_v58, %v298_v58 }
  0xaf   : > { %1250 = vmatprep.subr.bf16.mxu0 %v1528_v20  ;;  %v1564_v62 = vld [vmem:[#allocation5 + $0x1b0] sm:$0xff]   ;;  %v1566_v63 = vld [vmem:[#allocation5 + $0x138] sm:$0xff]   ;;  %v941_v3 = vld [vmem:[#allocation8] sm:$0xff] }
  0xb0   : > { %1271 = vmatpush3.bf16.msra.mxu1 %v1527_v19  ;;  %v1569_v0 = vld [vmem:[#allocation5 + $0x1b8] sm:$0xff]   ;;  %v942_v4 = vld [vmem:[#allocation8 + $0x8] sm:$0xff]  ;;  %v945_v10 = vld [vmem:[#allocation8 + $0x20] sm:$0xff] }
  0xb1   : > { %1272 = vmatprep.subr.bf16.mxu1 %v1530_v22  ;;  %v1570_v2 = vld [vmem:[%s2042_s27 + $0x18] ss:$0 sps:$4 sm:$0xff]   ;;  %v943_v5 = vld [vmem:[#allocation8 + $0x10] sm:$0xff]  ;;  %v1388_v7 = vpack.c.bf16 %v942_v4, %v941_v3  ;;  %v946_v11 = vld [vmem:[#allocation8 + $0x28] sm:$0xff] }
  0xb2   : > { %1251 = vmatpush3.bf16.msra.mxu0 %v1529_v21  ;;  %v944_v8 = vld [vmem:[#allocation8 + $0x18] sm:$0xff]  ;;  %v1394_v12 = vpack.c.bf16 %v946_v11, %v945_v10  ;;  %v947_v13 = vld [vmem:[#allocation8 + $0x30] sm:$0xff]  ;;  %v949_v16 = vld [vmem:[#allocation8 + $0x40] sm:$0xff] }
  0xb3   : > { %1252 = vmatprep.subr.bf16.mxu0 %v1532_v24  ;;  %v1391_v9 = vpack.c.bf16 %v944_v8, %v943_v5  ;;  %v948_v14 = vld [vmem:[#allocation8 + $0x38] sm:$0xff]  ;;  %v950_v17 = vld [vmem:[#allocation8 + $0x48] sm:$0xff]  ;;  %v951_v19 = vld [vmem:[#allocation8 + $0x50] sm:$0xff] }
  0xb4   : > { %1273 = vmatpush3.bf16.msra.mxu1 %v1531_v23  ;;  %v1397_v15 = vpack.c.bf16 %v948_v14, %v947_v13  ;;  %v1400_v18 = vpack.c.bf16 %v950_v17, %v949_v16  ;;  %v952_v20 = vld [vmem:[#allocation8 + $0x58] sm:$0xff]  ;;  %v953_v22 = vld [vmem:[#allocation8 + $0x60] sm:$0xff]  ;;  %v954_v23 = vld [vmem:[#allocation8 + $0x68] sm:$0xff] }
  0xb5   : > { %1274 = vmatprep.subr.bf16.mxu1 %v1534_v26  ;;  %v1403_v21 = vpack.c.bf16 %v952_v20, %v951_v19  ;;  %v1406_v24 = vpack.c.bf16 %v954_v23, %v953_v22  ;;  %v956_v26 = vld [vmem:[#allocation8 + $0x78] sm:$0xff] }
  0xb6   : > { %1253 = vmatpush3.bf16.msra.mxu0 %v1533_v25  ;;  %v955_v25 = vld [vmem:[#allocation8 + $0x70] sm:$0xff] }
  0xb7   : > { %1254 = vmatprep.subr.bf16.mxu0 %v1536_v28 }
  0xb8   : > { %1275 = vmatpush3.bf16.msra.mxu1 %v1535_v27  ;;  %v1409_v27 = vpack.c.bf16 %v956_v26, %v955_v25 }
  0xb9   : > { %1276 = vmatprep.subr.bf16.mxu1 %v1538_v30 }
  0xba   : > { %1255 = vmatpush3.bf16.msra.mxu0 %v1537_v29  ;;  %v1171_v29 = vld [vmem:[#allocation7] ss:$0 sm:$0xff] }
  0xbb   : > { %1284 = vmatprep.subr.bf16.mxu0 %v1542_v35 }
  0xbc   : > { %1277 = vmatpush3.bf16.msra.mxu1 %v1541_v34 }
  0xbd   : > { %813 = vmatmul.mubr.bf16.vlgmr.msra.gmra.mrb[0].mxu0 %v1172_v32  ;;  %1332 = vmatprep.subr.bf16.mxu1 %v1798_v42 }
  0xbe   : > { %1285 = vmatpush3.bf16.msra.mxu0 %v1545_v39  ;;  %892 = vmatprep.mubr.bf16.mxu0 %v1177_v60 }
  0xbf   : > { %853 = vmatmul.mubr.bf16.vlgmr.msra.gmra.mrb[0].mxu1 %v1174_v37  ;;  %1286 = vmatprep.subr.bf16.mxu0 %v1547_v41 }
  0xc0   : > { %1333 = vmatpush3.bf16.msra.mxu1 %v1546_v40  ;;  %1348 = vmatprep.mubr.msk.bf16.mxu1 %vm1799_vm0, %v1798_v42 }
  0xc1   : > { %1334 = vmatprep.subr.bf16.mxu1 %v1798_v42 }
  0xc2   : > { %1287 = vmatpush3.bf16.msra.mxu0 %v1548_v43 }
  0xc3   : > { %1288 = vmatprep.subr.bf16.mxu0 %v1550_v45 }
  0xc4   : > { %1335 = vmatpush3.bf16.msra.mxu1 %v1549_v44 }
  0xc5   : > { %1336 = vmatprep.subr.bf16.mxu1 %v1798_v42 }
  0xc6   : > { %1289 = vmatpush3.bf16.msra.mxu0 %v1551_v46 }
  0xc7   : > { %1290 = vmatprep.subr.bf16.mxu0 %v1553_v48 }
  0xc8   : > { %1337 = vmatpush3.bf16.msra.mxu1 %v1552_v47 }
  0xc9   : > { %1338 = vmatprep.subr.bf16.mxu1 %v1798_v42 }
  0xca   : > { %1291 = vmatpush3.bf16.msra.mxu0 %v1554_v49 }
  0xcb   : > { %1292 = vmatprep.subr.bf16.mxu0 %v1556_v50 }
  0xcc   : > { %1339 = vmatpush3.bf16.msra.mxu1 %v1555_v51 }
  0xcd   : > { %1340 = vmatprep.subr.bf16.mxu1 %v1798_v42 }
  0xce   : > { %1293 = vmatpush3.bf16.msra.mxu0 %v1557_v52 }
  0xcf   : > { %1294 = vmatprep.subr.bf16.mxu0 %v1559_v53  ;;  %v1235_v53 = vld [vmem:[#allocation10] ss:$0 sm:$0xff] }
  0xd0   : > { %1341 = vmatpush3.bf16.msra.mxu1 %v1558_v54 }
  0xd1   : > { %1342 = vmatprep.subr.bf16.mxu1 %v1798_v42 }
  0xd2   : > { %1295 = vmatpush3.bf16.msra.mxu0 %v1560_v55 }
  0xd3   : > { %1296 = vmatprep.subr.bf16.mxu0 %v1562_v56 }
  0xd4   : > { %1343 = vmatpush3.bf16.msra.mxu1 %v1561_v57 }
  0xd5   : > { %1344 = vmatprep.subr.bf16.mxu1 %v1798_v42 }
  0xd6   : > { %1297 = vmatpush3.bf16.msra.mxu0 %v1563_v59 }
  0xd7   : > { %1298 = vmatprep.subr.bf16.mxu0 %v1565_v61 }
  0xd8   : > { %1345 = vmatpush3.bf16.msra.mxu1 %v1564_v62 }
  0xd9   : > { %1346 = vmatprep.subr.bf16.mxu1 %v1798_v42 }
  0xda   : > { %1299 = vmatpush3.bf16.msra.mxu0 %v1566_v63 }
  0xdb   : > { %1387 = vmatprep.subr.bf16.mxu0 %v1800_v6 }
  0xdc   : > { %1347 = vmatpush3.bf16.msra.mxu1 %v1569_v0 }
  0xdd   : > { %893 = vmatmul.mubr.bf16.vlgmr.msra.gmra.mrb[4].mxu0 %v1176_v1 }
  0xde   : > { %1384 = vmatprep.mubr.msk.f32.mxu0 %vm1799_vm0, %v1798_v42  ;;  %1389 = vmatpush3.bf16.msra.mxu0 %v1388_v7 }
  0xdf   : > { %1349 = vmatmul.mubr.bf16.vlgmr.msra.gmra.mrb[4].mxu1 %v1570_v2  ;;  %1390 = vmatprep.subr.bf16.mxu0 %v1800_v6 }
  0xe2   : > { %1392 = vmatpush3.bf16.msra.mxu0 %v1391_v9 }
  0xe3   : > { %1393 = vmatprep.subr.bf16.mxu0 %v1800_v6 }
  0xe6   : > { %1395 = vmatpush3.bf16.msra.mxu0 %v1394_v12 }
  0xe7   : > { %1396 = vmatprep.subr.bf16.mxu0 %v1800_v6 }
  0xea   : > { %1398 = vmatpush3.bf16.msra.mxu0 %v1397_v15 }
  0xeb   : > { %1399 = vmatprep.subr.bf16.mxu0 %v1800_v6 }
  0xee   : > { %1401 = vmatpush3.bf16.msra.mxu0 %v1400_v18 }
  0xef   : > { %1402 = vmatprep.subr.bf16.mxu0 %v1800_v6 }
  0xf2   : > { %1404 = vmatpush3.bf16.msra.mxu0 %v1403_v21 }
  0xf3   : > { %1405 = vmatprep.subr.bf16.mxu0 %v1800_v6 }
  0xf6   : > { %1407 = vmatpush3.bf16.msra.mxu0 %v1406_v24 }
  0xf7   : > { %1408 = vmatprep.subr.bf16.mxu0 %v1800_v6 }
  0xfa   : > { %1410 = vmatpush3.bf16.msra.mxu0 %v1409_v27 }
 0x190   : > { %v1256_v28 = vpop.f32.mrb[0].mxu0 }
 0x191   : > { %v1257_v30 = vpop.f32.mrb[1].mxu0 }
 0x192   : > { %v1258_v31 = vadd.f32 %v1257_v30, %v1256_v28  ;;  %v1259_v32 = vpop.f32.mrb[2].mxu0  ;;  %v1278_v33 = vpop.f32.mrb[0].mxu1 }
 0x193   : > { %v1260_v34 = vpop.f32.mrb[3].mxu0  ;;  %v1279_v35 = vpop.f32.mrb[1].mxu1 }
 0x194   : > { %v815_v36 = vadd.f32 %v1258_v31, %v1171_v29  ;;  %v1280_v37 = vadd.f32 %v1279_v35, %v1278_v33  ;;  %v1281_v38 = vpop.f32.mrb[2].mxu1 }
 0x195   : > { %v1282_v39 = vpop.f32.mrb[3].mxu1 }
 0x196   : > { %v855_v40 = vadd.f32 %v1280_v37, %v815_v36 }
 0x1b0   : > { %v1300_v41 = vpop.f32.mrb[4].mxu0 }
 0x1b1   : > { %v1301_v42 = vpop.f32.mrb[5].mxu0 }
 0x1b2   : > { %v1302_v43 = vadd.f32 %v1301_v42, %v1300_v41  ;;  %v1303_v44 = vpop.f32.mrb[6].mxu0  ;;  %v934_v45 = vpop.f32.mrb[4].mxu1 }
 0x1b3   : > { %v1304_v46 = vpop.f32.mrb[7].mxu0  ;;  %v1350_v47 = vpop.f32.mrb[5].mxu1 }
 0x1b4   : > { %v895_v48 = vadd.f32 %v1302_v43, %v855_v40  ;;  %v937_v49 = vpop.f32.mrb[6].mxu1 }
 0x1b5   : > { %v1351_v50 = vpop.f32.mrb[7].mxu1 }
 0x1b6   : > { %v935_v51 = vadd.f32 %v934_v45, %v895_v48 }
 0x1b8   : > { %v940_v52 = vmax.f32 %v935_v51, 0.0 }
 0x1ba   : > { %1385 = vmatmul.mubr.f32.vlgmr.msra.gmra.mrb[8].mxu0 %v940_v52 }
 0x28d   : > { %v1030_v54 = vpop.f32.mrb[8].mxu0 }
 0x28e   : > { %v1031_v55 = vadd.f32 %v1235_v53, %v1030_v54  ;;  %v1386_v56 = vpop.f32.mrb[9].mxu0 }
 0x290   : > { %1034 = vst [vmem:[%s294_s16] sm:$0xff] %v1031_v55 }
 0x291   : > { %1726 = shalt.err (!%p1723_p12)
}
 0x292   : > { %s1727_s30 = scalar_lea.hbm %s2067_s15, 128  ;;  %s1731_s8 = scalar_lea.hbm %s2116_s5, 256 }
 0x293   : > { %p1728_p13 = scmp.ne.s32.totalorder %s2067_s15, %s1727_s30  ;;  %p1732_p9 = scmp.lt.u32.totalorder %s2067_s15, %s2116_s5 }
 0x294   : > { %p1733_p4 = scmp.lt.u32.totalorder %s1731_s8, %s1727_s30  ;;  %p1735_p0 = scmp.lt.u32.totalorder %s1727_s30, %s2067_s15 }
 0x295   : > { %p1729_p1 = pnand %p1728_p13, %p2133_p6 }
 0x296   : > { %p1734_p8 = por %p1733_p4, %p1732_p9 }
 0x297   : > { %p1730_p7 = pneg %p1729_p1 }
 0x298   : > { %p1736_p2 = por %p1735_p0, %p1734_p8 }
 0x29a   : > { %p1737_p5 = pnand %p1736_p2, %p1730_p7 }
 0x29c   : > { %1740 = shalt.err (!%p1737_p5)
}
 0x29d   : > { %1432 = dma.vmem_to_hbm [thread:$0]  (%p2133_p6), %s2069_s26, 128, %s2067_s15, %s1036_s17  }
 0x29e PF: > { %s1061_s10 = sand.u32 1, %s1775_s18   ;;  %p2134_p10 = scmp.ne.s32.totalorder %s2126_s13, 0 }
 0x29f   : > { %p2135_p11 = scmp.ge.s32.totalorder %s1787_s21, 2  ;;  %s1062_s16 = scalar_lea.sflag [#allocation4], %s1061_s10 }
 0x2a1   : > { %p1452_p3 = pnand %p2135_p11, %p2134_p10 }
 0x2a3   : > { %1770 = dma.done.wait (!%p1452_p3), %s1062_s16, 128  }
 0x2a4   : > { %1772 = vsyncadd (!%p1452_p3), %s1062_s16, 4294967168  ;;  %p20_p12 = scmp.ge.s32.totalorder %s1968_s28, 4   ;;  %s2136_s18 = smov %s1779_s19 }
 0x2a5   : > { %s2137_s19 = smov %s1783_s20  ;;  %s2138_s20 = smov %s1979_s9 }
 0x2a6   : > { %s2139_s21 = smov %s1968_s28  ;;  %22 = sbr.rel (!%p20_p12) target bundleno = 7 (0x7), region = 101 }
 0x2ad   :  { %1067 = vsyncpa [#allocation3], 1 }
 0x2ae   :  { %1069 = vsyncpa [#allocation3 + $0x1], 1 }
 0x2af   :  { %1070 = vsyncpa [#allocation6], 1 }
 0x2b0   :  { %1071 = vsyncpa [#allocation9], 1 }
 0x2b1   :  { %1072 = vsyncpa [#allocation4], 1 }
 0x2b2   :  { %1074 = vsyncpa [#allocation4 + $0x1], 1 }

</bundles_post_ra>
